<compile_context>
chip_gen: v7x
topology: tpu7x:2x2x1
jax: 0.10.0
libtpu: 0.0.40
codegen_flags: <defaults>
</compile_context>

<pallas_src>
import functools

import jax
import jax.numpy as jnp
from jax.experimental import pallas as pl
from jax.experimental.pallas import tpu as pltpu


# ------------------------------ kernel bodies ------------------------------ #

def _mlp_gate(pooled_c1, w1_ref, w2_ref):
    """pooled_c1: (C, 1) fp32 channel means. w1: (Cr, C), w2: (C, Cr).

    Returns the (C, 1) fp32 sigmoid gate. Tiny mat-vec products; flops are
    negligible, done once per batch element.
    """
    w1 = w1_ref[...].astype(jnp.float32)
    w2 = w2_ref[...].astype(jnp.float32)
    h = jnp.maximum(
        jnp.dot(w1, pooled_c1, preferred_element_type=jnp.float32), 0.0)   # (Cr, 1)
    return jax.nn.sigmoid(
        jnp.dot(w2, h, preferred_element_type=jnp.float32))                # (C, 1)


def _fused_kernel(x_ref, w1_ref, w2_ref, o_ref, *, inv_hw):
    """Single-pass pool + MLP + rescale; x_ref/o_ref: (1, C, HW)."""
    x = x_ref[0]                                                            # (C, HW)
    pooled = jnp.sum(x, axis=-1, dtype=jnp.float32, keepdims=True) * inv_hw
    gate = _mlp_gate(pooled, w1_ref, w2_ref)                                # (C, 1)
    o_ref[0] = x * gate.astype(o_ref.dtype)                                 # lane broadcast


def _pool_mlp_kernel(x_ref, w1_ref, w2_ref, gate_ref, *, inv_hw):
    """Streaming fp32 sum-pool over spatial tiles; MLP folded into the epilogue.

    gate_ref (1, C, 1) fp32 doubles as the running-sum accumulator — it is
    resident across the last ("arbitrary") spatial-tile grid axis.
    """
    t = pl.program_id(1)

    @pl.when(t == 0)
    def _():
        gate_ref[...] = jnp.zeros_like(gate_ref)

    gate_ref[0] += jnp.sum(x_ref[0], axis=-1, dtype=jnp.float32, keepdims=True)

    @pl.when(t == pl.num_programs(1) - 1)
    def _():
        pooled = gate_ref[0] * inv_hw                                       # (C, 1)
        gate_ref[0] = _mlp_gate(pooled, w1_ref, w2_ref)


def _scale_kernel(x_ref, gate_ref, o_ref):
    """Channel-wise rescale; x_ref/o_ref: (1, C, tHW); gate_ref: (1, C, 1) fp32."""
    o_ref[0] = x_ref[0] * gate_ref[0].astype(o_ref.dtype)


# --------------------------------- wrapper --------------------------------- #

def _tpu_vmem_budgets():
    """(tile_budget_bytes, vmem_limit_bytes), generation-aware with safe fallback."""
    cap = 64 * 1024 * 1024          # conservative default = v7x per-TensorCore VMEM
    try:
        info = pltpu.get_tpu_info()
        for attr in ("vmem_capacity_bytes", "vmem_size_bytes", "vmem_bytes"):
            v = getattr(info, attr, None)
            if v:
                cap = int(v)
                break
    except Exception:
        pass
    # 4 double-buffered big tiles (in + out) must fit the tile budget with
    # headroom; scoped VMEM limit stays well under physical capacity.
    tile_budget = int(cap * 0.35)                       # ~22 MiB v7x, ~45 MiB v5e/v6e
    vmem_limit = min(int(cap * 0.70), 100 * 1024 * 1024)
    return tile_budget, vmem_limit


def _choose_spatial_tile(hw_padded, C, itemsize, budget_bytes):
    """Largest lane-dense (multiple-of-128) spatial tile dividing hw_padded."""
    cands = [t for t in range(128, hw_padded + 1, 128) if hw_padded % t == 0]
    fits = [t for t in cands if 4 * C * t * itemsize <= budget_bytes]
    return max(fits) if fits else 128


def ca_layer(x_nchw, w1, w2, *, force_two_phase=False):
    """x_nchw: (B, C, H, W); w1: (C//r, C); w2: (C, C//r). Returns (B, C, H, W)."""
    B, C, H, W = x_nchw.shape
    HW = H * W
    x = x_nchw.reshape(B, C, HW)
    itemsize = jnp.dtype(x.dtype).itemsize
    inv_hw = float(1.0 / HW)
    tile_budget, vmem_limit = _tpu_vmem_budgets()

    # ---------------- fused single-pass fast path --------------------------
    slab_bytes = 4 * C * HW * itemsize      # (in + out) x double-buffer
    if slab_bytes <= tile_budget and not force_two_phase:
        out = pl.pallas_call(
            functools.partial(_fused_kernel, inv_hw=inv_hw),
            out_shape=jax.ShapeDtypeStruct((B, C, HW), x.dtype),
            grid_spec=pltpu.PrefetchScalarGridSpec(
                num_scalar_prefetch=0,
                grid=(B,),
                in_specs=[
                    pl.BlockSpec((1, C, HW), lambda b: (b, 0, 0)),
                    pl.BlockSpec(w1.shape, lambda b: (0, 0)),
                    pl.BlockSpec(w2.shape, lambda b: (0, 0)),
                ],
                out_specs=pl.BlockSpec((1, C, HW), lambda b: (b, 0, 0)),
            ),
            compiler_params=pltpu.CompilerParams(
                dimension_semantics=("parallel",),
                vmem_limit_bytes=vmem_limit),
            cost_estimate=pl.CostEstimate(
                flops=2 * B * C * HW,
                transcendentals=B * C,
                bytes_accessed=2 * B * C * HW * itemsize),
        )(x, w1, w2)
        return out.reshape(B, C, H, W)

    # ---------------- two-phase streaming path ------------------------------
    # Pad spatial axis to a multiple of 128 so tiled blocks stay lane-dense and
    # legal; zeros do not perturb the sum (we divide by the true HW).
    hw_p = ((HW + 127) // 128) * 128
    x_p = x if hw_p == HW else jnp.pad(x, ((0, 0), (0, 0), (0, hw_p - HW)))
    tHW = _choose_spatial_tile(hw_p, C, itemsize, tile_budget)
    n_t = hw_p // tHW

    # phase 1: streaming fp32 sum-pool + fused MLP epilogue -> (B, C, 1) gate
    gate = pl.pallas_call(
        functools.partial(_pool_mlp_kernel, inv_hw=inv_hw),
        out_shape=jax.ShapeDtypeStruct((B, C, 1), jnp.float32),
        grid_spec=pltpu.PrefetchScalarGridSpec(
            num_scalar_prefetch=0,
            grid=(B, n_t),
            in_specs=[
                pl.BlockSpec((1, C, tHW), lambda b, t: (b, 0, t)),
                pl.BlockSpec(w1.shape, lambda b, t: (0, 0)),
                pl.BlockSpec(w2.shape, lambda b, t: (0, 0)),
            ],
            out_specs=pl.BlockSpec((1, C, 1), lambda b, t: (b, 0, 0)),
        ),
        compiler_params=pltpu.CompilerParams(
            dimension_semantics=("parallel", "arbitrary"),
            vmem_limit_bytes=vmem_limit),
        cost_estimate=pl.CostEstimate(
            flops=B * C * hw_p,
            transcendentals=B * C,
            bytes_accessed=B * C * hw_p * itemsize + B * C * 4),
    )(x_p, w1, w2)

    # phase 2: streaming channel-wise rescale (lane-dense output tiles)
    out = pl.pallas_call(
        _scale_kernel,
        out_shape=jax.ShapeDtypeStruct((B, C, hw_p), x.dtype),
        grid_spec=pltpu.PrefetchScalarGridSpec(
            num_scalar_prefetch=0,
            grid=(B, n_t),
            in_specs=[
                pl.BlockSpec((1, C, tHW), lambda b, t: (b, 0, t)),
                pl.BlockSpec((1, C, 1), lambda b, t: (b, 0, 0)),
            ],
            out_specs=pl.BlockSpec((1, C, tHW), lambda b, t: (b, 0, t)),
        ),
        compiler_params=pltpu.CompilerParams(
            dimension_semantics=("parallel", "parallel"),
            vmem_limit_bytes=vmem_limit),
        cost_estimate=pl.CostEstimate(
            flops=B * C * hw_p,
            transcendentals=0,
            bytes_accessed=2 * B * C * hw_p * itemsize + B * C * 4),
    )(x_p, gate)

    if hw_p != HW:
        out = out[:, :, :HW]
    return out.reshape(B, C, H, W)


def ca_layer_ref(x, w1, w2):
    """Pure-JAX reference matching the PyTorch CALayer forward (bias=False)."""
    pooled = jnp.mean(x, axis=(2, 3))                    # (B, C)
    h = jnp.maximum(pooled @ w1.T, 0.0)                  # (B, C//r)
    s = jax.nn.sigmoid(h @ w2.T)                         # (B, C)
    return x * s[:, :, None, None]


if __name__ == "__main__":
    # Module config: channel=32, reduction=4 -> hidden = 8 (bias=False)
    B, C, H, W = 2, 32, 16, 16
    reduction = 4
    Cr = C // reduction

    key = jax.random.PRNGKey(0)
    kx, k1, k2 = jax.random.split(key, 3)
    x = jax.random.normal(kx, (B, C, H, W), dtype=jnp.float32)
    # Conv2d 1x1 weights with the trailing 1x1 kernel dims squeezed: (out_ch, in_ch)
    w1 = jax.random.normal(k1, (Cr, C), dtype=jnp.float32) * 0.1
    w2 = jax.random.normal(k2, (C, Cr), dtype=jnp.float32) * 0.1

    ref = ca_layer_ref(x, w1, w2)

    # Fast path (fused single-pass kernel).
    out_fused = jax.block_until_ready(ca_layer(x, w1, w2))
    assert out_fused.shape == (B, C, H, W)
    assert jnp.allclose(out_fused, ref, atol=1e-5, rtol=1e-5), \
        f"fused path max abs diff {jnp.max(jnp.abs(out_fused - ref))}"

    # Streaming two-phase path (exercised explicitly for coverage).
    out_stream = jax.block_until_ready(ca_layer(x, w1, w2, force_two_phase=True))
    assert jnp.allclose(out_stream, ref, atol=1e-5, rtol=1e-5), \
        f"streaming path max abs diff {jnp.max(jnp.abs(out_stream - ref))}"

    print("KERNEL_OK")
</pallas_src>

<mosaic_0001>
module attributes {stable_mosaic.version = 11 : i64} {
  func.func @_fused_kernel(%arg0: i32, %arg1: memref<1x32x256xf32, #tpu.memory_space<vmem>>, %arg2: memref<8x32xf32, #tpu.memory_space<vmem>>, %arg3: memref<32x8xf32, #tpu.memory_space<vmem>>, %arg4: memref<1x32x256xf32, #tpu.memory_space<vmem>>) attributes {dimension_semantics = [#tpu.dimension_semantics<parallel>], iteration_bounds = array<i64: 2>, scalar_prefetch = 0 : i64, scratch_operands = 0 : i64, tpu.core_type = #tpu.core_type<tc>, window_params = [{transform_indices = @transform_0, window_bounds = array<i64: 1, 32, 256>}, {pipeline_mode = #tpu.pipeline_mode<synchronous>, transform_indices = @transform_1, window_bounds = array<i64: 8, 32>}, {pipeline_mode = #tpu.pipeline_mode<synchronous>, transform_indices = @transform_2, window_bounds = array<i64: 32, 8>}, {transform_indices = @transform_3, window_bounds = array<i64: 1, 32, 256>}]} {
    %c0 = arith.constant 0 : index
    %c0_0 = arith.constant 0 : index
    %c0_1 = arith.constant 0 : index
    %0 = vector.load %arg1[%c0, %c0_0, %c0_1] : memref<1x32x256xf32, #tpu.memory_space<vmem>>, vector<1x32x256xf32>
    %1 = vector.shape_cast %0 : vector<1x32x256xf32> to vector<32x256xf32>
    %cst = arith.constant dense<0.000000e+00> : vector<32xf32>
    %2 = vector.multi_reduction <add>, %1, %cst [1] : vector<32x256xf32> to vector<32xf32>
    %3 = vector.shape_cast %2 : vector<32xf32> to vector<32x1xf32>
    %cst_2 = arith.constant 3.906250e-03 : f32
    %4 = vector.broadcast %cst_2 : f32 to vector<32x1xf32>
    %5 = arith.mulf %3, %4 : vector<32x1xf32>
    %c0_3 = arith.constant 0 : index
    %c0_4 = arith.constant 0 : index
    %6 = vector.load %arg2[%c0_3, %c0_4] : memref<8x32xf32, #tpu.memory_space<vmem>>, vector<8x32xf32>
    %c0_5 = arith.constant 0 : index
    %c0_6 = arith.constant 0 : index
    %7 = vector.load %arg3[%c0_5, %c0_6] : memref<32x8xf32, #tpu.memory_space<vmem>>, vector<32x8xf32>
    %cst_7 = arith.constant dense<0.000000e+00> : vector<8x1xf32>
    %8 = tpu.matmul %6, %5, %cst_7 {dimension_numbers = #tpu.dot_dimension_numbers<[1], [0], [0], [1], [0, 0, 1, 1], [], []>} : vector<8x32xf32>, vector<32x1xf32>, vector<8x1xf32> -> vector<8x1xf32>
    %cst_8 = arith.constant 0.000000e+00 : f32
    %9 = vector.broadcast %cst_8 : f32 to vector<8x1xf32>
    %10 = arith.maximumf %8, %9 : vector<8x1xf32>
    %cst_9 = arith.constant dense<0.000000e+00> : vector<32x1xf32>
    %11 = tpu.matmul %7, %10, %cst_9 {dimension_numbers = #tpu.dot_dimension_numbers<[1], [0], [0], [1], [0, 0, 1, 1], [], []>} : vector<32x8xf32>, vector<8x1xf32>, vector<32x1xf32> -> vector<32x1xf32>
    %12 = arith.negf %11 : vector<32x1xf32>
    %13 = math.exp %12 : vector<32x1xf32>
    %cst_10 = arith.constant 1.000000e+00 : f32
    %14 = vector.broadcast %cst_10 : f32 to vector<32x1xf32>
    %15 = arith.addf %14, %13 : vector<32x1xf32>
    %16 = arith.divf %14, %15 : vector<32x1xf32>
    %17 = vector.broadcast %16 : vector<32x1xf32> to vector<32x256xf32>
    %18 = arith.mulf %1, %17 : vector<32x256xf32>
    %c0_11 = arith.constant 0 : index
    %c0_12 = arith.constant 0 : index
    %c0_13 = arith.constant 0 : index
    %19 = vector.load %arg4[%c0_11, %c0_12, %c0_13] : memref<1x32x256xf32, #tpu.memory_space<vmem>>, vector<1x32x256xf32>
    %20 = vector.shape_cast %19 : vector<1x32x256xf32> to vector<32x256xf32>
    %21 = vector.shape_cast %18 : vector<32x256xf32> to vector<1x32x256xf32>
    tpu.vector_store %arg4[%c0_11, %c0_12, %c0_13], %21 {strides = array<i32>} : memref<1x32x256xf32, #tpu.memory_space<vmem>>, vector<1x32x256xf32>,
    return
  }
  func.func @transform_0(%arg0: i32) -> (i32, i32, i32) {
    %c0_i32 = arith.constant 0 : i32
    %c0_i32_0 = arith.constant 0 : i32
    %c0_i32_1 = arith.constant 0 : i32
    return %arg0, %c0_i32, %c0_i32_0 : i32, i32, i32
  }
  func.func @transform_1(%arg0: i32) -> (i32, i32) {
    %c0_i32 = arith.constant 0 : i32
    %c0_i32_0 = arith.constant 0 : i32
    %c0_i32_1 = arith.constant 0 : i32
    return %c0_i32, %c0_i32_0 : i32, i32
  }
  func.func @transform_2(%arg0: i32) -> (i32, i32) {
    %c0_i32 = arith.constant 0 : i32
    %c0_i32_0 = arith.constant 0 : i32
    %c0_i32_1 = arith.constant 0 : i32
    return %c0_i32, %c0_i32_0 : i32, i32
  }
  func.func @transform_3(%arg0: i32) -> (i32, i32, i32) {
    %c0_i32 = arith.constant 0 : i32
    %c0_i32_0 = arith.constant 0 : i32
    %c0_i32_1 = arith.constant 0 : i32
    return %arg0, %c0_i32, %c0_i32_0 : i32, i32, i32
  }
}

</mosaic_0001>

<bundles_post_ra>
// kernel: tpu_custom_call.1
= control target key start
LH: loop header
LB: loop body
LE: loop exit
PB: predicated region body
PF: predicated region fallthrough
CT: control target
= control target key end

     0   :  { %8 = vsyncpa [#allocation3], 0  ;;  %s1011_s0 = inlined_call_operand.hbm [shape: f32[2,32,256], index: 0, kind: input, shape index: {}]   ;;  %s1012_s1 = inlined_call_operand.vmem [shape: f32[8,32], index: 1, kind: input, shape index: {}]   ;;  %s1013_s2 = inlined_call_operand.vmem [shape: f32[32,8], index: 2, kind: input, shape index: {}]   ;;  %s1014_s3 = inlined_call_operand.hbm [shape: f32[2,32,256], index: 3, kind: output, shape index: {}]  }
   0x1   :  { %10 = vsyncpa [#allocation3 + $0x1], 0 }
   0x2   :  { %11 = vsyncpa [#allocation4], 0 }
   0x3   :  { %13 = vsyncpa [#allocation4 + $0x1], 0  ;;  %s798_s12 = smov 0   ;;  %s800_s13 = smov 0  }
   0x4   :  { %s802_s14 = smov 0   ;;  %s804_s15 = smov 0  }
   0x5 LB: > { %s819_s16 = sadd.s32 4294967295, %s766_s15   ;;  %s538_s17 = sadd.s32 4294967294, %s766_s15   ;;  %s766_s15 = sphi %s804_s15, %s1027_s15   ;;  %s762_s14 = sphi %s802_s14, %s1026_s14   ;;  %s758_s13 = sphi %s800_s13, %s1025_s13   ;;  %s754_s12 = sphi %s798_s12, %s1024_s12  }
   0x6   : > { %s823_s18 = sadd.s32 1, %s766_s15   ;;  %s26_s19 = sadd.s32 1, %s762_s14 }
   0x7   : > { %s23_s20 = ssub.s32 %s766_s15, %s823_s18  ;;  %p33_p0 = scmp.ne.s32.totalorder %s762_s14, %s758_s13 }
   0x8   : > { %p24_p1 = scmp.eq.s32.totalorder %s23_s20, 0  ;;  %p34_p2 = scmp.eq.s32.totalorder %s766_s15, 0 }
   0x9   : > { %p39_p3 = scmp.ne.s32.totalorder %s758_s13, %s754_s12  ;;  %p40_p4 = scmp.eq.s32.totalorder %s819_s16, 0 }
   0xa   : > { %s835_s21 = scalar_select %p24_p1, %s762_s14, %s26_s19  }
   0xb   : > { %p837_p5 = por %p34_p2, %p33_p0  ;;  %p841_p6 = por %p40_p4, %p39_p3 }
   0xc   : > { %p105_p7 = scmp.eq.s32.totalorder %s819_s16, 1  ;;  %p111_p8 = scmp.eq.s32.totalorder %s538_s17, 1 }
   0xd   : > { %p610_p10 = scmp.lt.s32.totalorder %s766_s15, 2  ;;  %s137_s26 = sand.u32 1, %s762_s14  }
   0xe   : > { %p848_p11 = por %p105_p7, %p33_p0  ;;  %p852_p12 = por %p111_p8, %p39_p3 }
   0xf   : > { %s561_s27 = sshll.u32 %s766_s15, 10  ;;  %s541_s28 = sshll.u32 %s137_s26, 6 }
  0x10   : > { %s1018_s24 = scalar_select %p848_p11, 1, 0 }
  0x11   : > { %s1019_s25 = scalar_select %p852_p12, 1, 0 }
  0x12   : > { %s861_s4 = scalar_lea.hbm %s1011_s0, %s561_s27  ;;  %s141_s5 = scalar_lea.vmem [#allocation2], %s541_s28 }
  0x13   : > { %s148_s6 = sshll.u32 %s141_s5, 4  ;;  %p865_p13 = pnand %p610_p10, %p837_p5  ;;  %s869_s6 = int_to_ptr.vmem [resolvable:$true] %s148_s6 }
  0x14   : > { %s871_s8 = scalar_lea.sflag [#allocation3], %s137_s26  ;;  %s670_s9 = scalar_lea.hbm %s861_s4, 1024 }
  0x15   : > { %p671_p0 = scmp.ne.s32.totalorder %s861_s4, %s670_s9  ;;  %p672_p1 = pneg %p865_p13 }
  0x16   : > { %s675_s17 = scalar_lea.hbm %s1011_s0, 2048  ;;  %p676_p4 = scmp.lt.u32.totalorder %s861_s4, %s1011_s0 }
  0x17   : > { %p673_p2 = pnand %p672_p1, %p671_p0  ;;  %p677_p5 = scmp.lt.u32.totalorder %s675_s17, %s670_s9 }
  0x18   : > { %p679_p8 = scmp.lt.u32.totalorder %s670_s9, %s861_s4 }
  0x19   : > { %p674_p3 = pneg %p673_p2  ;;  %p678_p7 = por %p677_p5, %p676_p4 }
  0x1b   : > { %p680_p10 = por %p679_p8, %p678_p7 }
  0x1d   : > { %p681_p9 = pnand %p680_p10, %p674_p3 }
  0x1f   : > { %684 = shalt.err (!%p681_p9)
}
  0x20   : > { %s685_s22 = scalar_lea.vmem %s869_s6, 1024  ;;  %s768_s26 = smov [#allocation2]  }
  0x21   : > { %p686_p0 = scmp.ne.s32.totalorder %s869_s6, %s685_s22  ;;  %s690_s27 = sshll.u32 %s768_s26, 4  ;;  %s691_s27 = int_to_ptr.vmem [resolvable:$false] %s690_s27 }
  0x22   : > { %s692_s28 = scalar_lea.vmem %s691_s27, 2048  ;;  %p693_p11 = scmp.lt.s32.totalorder %s869_s6, %s691_s27 }
  0x23   : > { %p688_p2 = pnand %p686_p0, %p672_p1  ;;  %p694_p4 = scmp.lt.s32.totalorder %s692_s28, %s685_s22 }
  0x25   : > { %p689_p12 = pneg %p688_p2  ;;  %p695_p5 = por %p694_p4, %p693_p11 }
  0x27   : > { %p696_p7 = pnand %p695_p5, %p689_p12 }
  0x29   : > { %699 = shalt.err (!%p696_p7)
}
  0x2a   : > { %s769_s29 = smov 256   ;;  %s770_s30 = smov 16  }
  0x2b   : > { %605 = dma.hbm_to_vmem [thread:$0]  (!%p865_p13), %s861_s4, 1024, %s869_s6, %s871_s8, %s769_s29, %s769_s29, %s770_s30  }
  0x2c   : > { %p544_p9 = scmp.ge.s32.totalorder %s766_s15, 1  ;;  %p156_p1 = scmp.lt.s32.totalorder %s766_s15, 3 }
  0x2e   : > { %p157_p3 = pnand %p544_p9, %p156_p1 }
  0x2f   : > { %s902_s5 = sand.u32 (!%p157_p3), 1, %s758_s13  }
  0x30   : > { %160 = sbr.rel (%p157_p3) target bundleno = 825 (0x339), region = 32  ;;  %s545_s9 = sshll.u32 (!%p157_p3), %s902_s5, 6 }
  0x31   : > { %s163_s10 = scalar_lea.sflag (!%p157_p3), [#allocation3], %s902_s5  ;;  %s166_s11 = scalar_lea.vmem (!%p157_p3), [#allocation2], %s545_s9 }
  0x37   : > { %745 = dma.done.wait (%p841_p6), %s163_s10, 1024  }
  0x38   : > { %747 = vsyncadd (%p841_p6), %s163_s10, 4294966272  ;;  %v912_v0 = vld [vmem:[%s166_s11 + $0x20] sm:$0xff]  ;;  %v914_v1 = vld [vmem:[%s166_s11 + $0x28] sm:$0xff]  ;;  %v771_v12 = vmov 0.0|0.0   ;;  %vm772_vm0 = vmmov 0   ;;  %v773_v13 = vmov 0.0  }
  0x39   : > { %v916_v2 = vld [vmem:[%s166_s11] sm:$0xff]  ;;  %v203_v3 = vadd.f32 %v914_v1, %v912_v0  ;;  %v920_v4 = vld [vmem:[%s166_s11 + $0x8] sm:$0xff]  ;;  %v922_v5 = vld [vmem:[%s166_s11 + $0x30] sm:$0xff]  ;;  %592 = vmatprep.subr.bf16.mxu0 %v771_v12  ;;  %581 = vmatprep.mubr.msk.f32.mxu0 %vm772_vm0, %v773_v13  ;;  %vm218_vm1 = vcmask 261120   ;;  %vm293_vm2 = vcmask 64512   ;;  %v774_v32 = vmov 0  }
  0x3a   : > { %v924_v6 = vld [vmem:[%s166_s11 + $0x38] sm:$0xff]  ;;  %v197_v7 = vadd.f32 %v920_v4, %v916_v2  ;;  %v928_v8 = vld [vmem:[%s166_s11 + $0x10] sm:$0xff]  ;;  %v213_v24 = vld [vmem:[%s1012_s1] sm:$0xff]  ;;  %653 = vset.pattern.permute.xlu1 %v774_v32  ;;  %652 = vset.pattern.permute.xlu0 %v774_v32  ;;  %s188_s27 = scalar_lea.vmem [#allocation5], %s545_s9  ;;  %s562_s29 = sshll.u32 %s819_s16, 10 }
  0x3b   : > { %v930_v9 = vld [vmem:[%s166_s11 + $0x18] sm:$0xff]  ;;  %204 = vadd.xlane.f32.xlu1 %v203_v3  ;;  %v206_v10 = vadd.f32 %v924_v6, %v922_v5  ;;  %v214_v25 = vld [vmem:[%s1013_s2] sm:$0xff]  ;;  %v215_v29 = vld [vmem:[%s1013_s2 + $0x8] sm:$0xff]  ;;  %s465_s28 = sshll.u32 %s188_s27, 4  ;;  %s965_s10 = scalar_lea.hbm %s1014_s3, %s562_s29  ;;  %s960_s28 = int_to_ptr.vmem [resolvable:$true] %s465_s28 }
  0x3c   : > { %198 = vadd.xlane.f32.xlu0 %v197_v7  ;;  %v200_v11 = vadd.f32 %v930_v9, %v928_v8  ;;  %586 = vmatprep.mubr.msk.f32.mxu1 %vm293_vm2, %v214_v25  ;;  %v216_v30 = vld [vmem:[%s1013_s2 + $0x10] sm:$0xff]  ;;  %v217_v31 = vld [vmem:[%s1013_s2 + $0x18] sm:$0xff]  ;;  %s452_s16 = scalar_lea.sflag [#allocation4], %s902_s5  ;;  %s700_s11 = scalar_lea.vmem %s960_s28, 1024 }
  0x3d   : > { %p701_p6 = scmp.ne.s32.totalorder %s960_s28, %s700_s11  ;;  %p1021_p11 = scmp.ne.s32.totalorder %s1018_s24, 0 }
  0x3e   : > { %s775_s23 = smov [#allocation5]  }
  0x3f   : > { %207 = vadd.xlane.f32.xlu1 %v206_v10  ;;  %p702_p12 = pnand %p701_p6, %p1021_p11  ;;  %s704_s4 = sshll.u32 %s775_s23, 4  ;;  %s705_s4 = int_to_ptr.vmem [resolvable:$false] %s704_s4 }
  0x40   : > { %201 = vadd.xlane.f32.xlu0 %v200_v11  ;;  %s706_s6 = scalar_lea.vmem %s705_s4, 2048  ;;  %p707_p8 = scmp.lt.s32.totalorder %s960_s28, %s705_s4 }
  0x41   : > { %p703_p13 = pneg %p702_p12  ;;  %p708_p10 = scmp.lt.s32.totalorder %s706_s6, %s700_s11 }
  0x43   : > { %p709_p0 = por %p708_p10, %p707_p8 }
  0x45   : > { %p710_p2 = pnand %p709_p0, %p703_p13 }
  0xc8   : > { %v205_v14 = vpop.xlane.xlu1 %204 }
  0xc9   : > { %v199_v15 = vpop.xlane.xlu0 %198  ;;  %v211_v20 = vmul.f32 0.00390625, %v205_v14 }
  0xca   : > { %v209_v18 = vmul.f32 0.00390625, %v199_v15 }
  0xcc   : > { %v208_v16 = vpop.xlane.xlu1 %207 }
  0xcd   : > { %v202_v17 = vpop.xlane.xlu0 %201  ;;  %v212_v21 = vmul.f32 0.00390625, %v208_v16 }
  0xce   : > { %v210_v19 = vmul.f32 0.00390625, %v202_v17 }
  0xcf   : > { %v596_v23 = vpack.c.bf16 %v212_v21, %v211_v20 }
  0xd0   : > { %v593_v22 = vpack.c.bf16 %v210_v19, %v209_v18 }
  0xd2   : > { %594 = vmatpush3.bf16.msra.mxu0 %v593_v22 }
  0xd3   : > { %595 = vmatprep.subr.bf16.mxu0 %v771_v12 }
  0xd6   : > { %597 = vmatpush3.bf16.msra.mxu0 %v596_v23 }
  0xd9   : > { %582 = vmatmul.mubr.msk.f32.vlgmr.msra.gmra.mrb[0].mxu0 %vm218_vm1, %v213_v24 }
 0x1ac   : > { %v288_v26 = vpop.f32.mrb[0].mxu0 }
 0x1ad   : > { %v292_v27 = vmax.f32 %v288_v26, 0.0  ;;  %v583_v28 = vpop.f32.mrb[1].mxu0 }
 0x1af   : > { %584 = vmatprep.subr.mxu1 %v292_v27 }
 0x1b0   : > { %585 = vmatpush3.msra.mxu1 %v292_v27 }
 0x1b1   : > { %587 = vmatmul.mubr.msk.f32.vlgmr.msra.gmra.mrb[0].mxu1 %vm293_vm2, %v215_v29 }
 0x1b2   : > { %589 = vmatprep.mubr.msk.f32.mxu1 %vm293_vm2, %v216_v30 }
 0x1b5   : > { %590 = vmatmul.mubr.msk.f32.gmra.mrb[2].mxu1 %vm293_vm2, %v217_v31 }
 0x284   : > { %v588_v33 = vpop.f32.mrb[0].mxu1 }
 0x285   : > { %v553_v34 = vmul.f32 -1.442695, %v588_v33  ;;  %v372_v35 = vpop.f32.mrb[1].mxu1 }
 0x286   : > { %v552_v36 = vmul.f32 -1.442695, %v372_v35 }
 0x287   : > { %654 = vpow2.f32 %v553_v34 }
 0x288   : > { %656 = vpow2.f32 %v552_v36  ;;  %v591_v37 = vpop.f32.mrb[2].mxu1 }
 0x289   : > { %v555_v38 = vmul.f32 -1.442695, %v591_v37  ;;  %v382_v39 = vpop.f32.mrb[3].mxu1 }
 0x28a   : > { %v554_v40 = vmul.f32 -1.442695, %v382_v39 }
 0x28b   : > { %658 = vpow2.f32 %v555_v38 }
 0x28c   : > { %660 = vpow2.f32 %v554_v40 }
 0x291   : > { %v655_v41 = vpop.eup %654 }
 0x292   : > { %v657_v42 = vpop.eup %656  ;;  %v404_v43 = vadd.f32 1.0, %v655_v41 }
 0x293   : > { %v403_v44 = vadd.f32 1.0, %v657_v42 }
 0x294   : > { %662 = vrcp.f32 %v404_v43 }
 0x295   : > { %v659_v45 = vpop.eup %658  ;;  %664 = vrcp.f32 %v403_v44 }
 0x296   : > { %v661_v46 = vpop.eup %660  ;;  %v406_v48 = vadd.f32 1.0, %v659_v45 }
 0x297   : > { %v405_v47 = vadd.f32 1.0, %v661_v46 }
 0x299   : > { %666 = vrcp.f32 %v405_v47 }
 0x29a   : > { %668 = vrcp.f32 %v406_v48 }
 0x29e   : > { %v663_v49 = vpop.eup %662 }
 0x29f   : > { %v665_v50 = vpop.eup %664  ;;  %422 = vperm.xlu1 %653, %v663_v49  }
 0x2a0   : > { %417 = vperm.xlu0 %652, %v665_v50  }
 0x2a3   : > { %v667_v51 = vpop.eup %666 }
 0x2a4   : > { %427 = vperm.xlu1 %653, %v667_v51   ;;  %v669_v52 = vpop.eup %668 }
 0x2a8   : > { %432 = vperm.xlu1 %653, %v669_v52  }
 0x31e   : > { %v423_v53 = vpop.permute.xlu1 %422 }
 0x31f   : > { %v437_v54 = vmul.f32 %v423_v53, %v928_v8  ;;  %v438_v55 = vmul.f32 %v423_v53, %v930_v9  ;;  %v418_v56 = vpop.permute.xlu0 %417 }
 0x320   : > { %v435_v57 = vmul.f32 %v418_v56, %v916_v2  ;;  %v436_v58 = vmul.f32 %v418_v56, %v920_v4 }
 0x321   : > { %445 = vst [vmem:[%s188_s27 + $0x10] sm:$0xff] %v437_v54  ;;  %446 = vst [vmem:[%s188_s27 + $0x18] sm:$0xff] %v438_v55 }
 0x322   : > { %443 = vst [vmem:[%s188_s27] sm:$0xff] %v435_v57  ;;  %444 = vst [vmem:[%s188_s27 + $0x8] sm:$0xff] %v436_v58 }
 0x323   : > { %v428_v59 = vpop.permute.xlu1 %427 }
 0x324   : > { %v439_v60 = vmul.f32 %v428_v59, %v912_v0  ;;  %v440_v61 = vmul.f32 %v428_v59, %v914_v1 }
 0x326   : > { %447 = vst [vmem:[%s188_s27 + $0x20] sm:$0xff] %v439_v60  ;;  %448 = vst [vmem:[%s188_s27 + $0x28] sm:$0xff] %v440_v61 }
 0x327   : > { %v433_v62 = vpop.permute.xlu1 %432 }
 0x328   : > { %v441_v63 = vmul.f32 %v433_v62, %v922_v5  ;;  %v442_v0 = vmul.f32 %v433_v62, %v924_v6 }
 0x32a   : > { %449 = vst [vmem:[%s188_s27 + $0x30] sm:$0xff] %v441_v63  ;;  %450 = vst [vmem:[%s188_s27 + $0x38] sm:$0xff] %v442_v0 }
 0x32b   : > { %713 = shalt.err (!%p710_p2)
}
 0x32c   : > { %s714_s7 = scalar_lea.hbm %s965_s10, 1024  ;;  %s718_s19 = scalar_lea.hbm %s1014_s3, 2048 }
 0x32d   : > { %p715_p4 = scmp.ne.s32.totalorder %s965_s10, %s714_s7  ;;  %p719_p9 = scmp.lt.u32.totalorder %s965_s10, %s1014_s3 }
 0x32e   : > { %p720_p1 = scmp.lt.u32.totalorder %s718_s19, %s714_s7  ;;  %p722_p6 = scmp.lt.u32.totalorder %s714_s7, %s965_s10 }
 0x32f   : > { %p716_p5 = pnand %p715_p4, %p1021_p11 }
 0x330   : > { %p721_p3 = por %p720_p1, %p719_p9 }
 0x331   : > { %p717_p7 = pneg %p716_p5 }
 0x332   : > { %p723_p12 = por %p722_p6, %p721_p3 }
 0x334   : > { %p724_p13 = pnand %p723_p12, %p717_p7 }
 0x336   : > { %727 = shalt.err (!%p724_p13)
}
 0x337   : > { %s776_s26 = smov 256   ;;  %s777_s27 = smov 16  }
 0x338   : > { %600 = dma.vmem_to_hbm [thread:$0]  (%p1021_p11), %s960_s28, 1024, %s965_s10, %s452_s16, %s776_s26, %s776_s26, %s777_s27  }
 0x339 PF: > { %s480_s29 = sand.u32 1, %s754_s12   ;;  %p1022_p8 = scmp.ne.s32.totalorder %s1019_s25, 0 }
 0x33a   : > { %p1023_p10 = scmp.ge.s32.totalorder %s766_s15, 2  ;;  %s481_s30 = scalar_lea.sflag [#allocation4], %s480_s29 }
 0x33c   : > { %p607_p0 = pnand %p1023_p10, %p1022_p8 }
 0x33e   : > { %749 = dma.done.wait (!%p607_p0), %s481_s30, 1024  }
 0x33f   : > { %751 = vsyncadd (!%p607_p0), %s481_s30, 4294966272  ;;  %p16_p2 = scmp.ge.s32.totalorder %s823_s18, 4   ;;  %s1024_s12 = smov %s758_s13 }
 0x340   : > { %s1025_s13 = smov %s762_s14  ;;  %s1026_s14 = smov %s835_s21 }
 0x341   : > { %s1027_s15 = smov %s823_s18  ;;  %18 = sbr.rel (!%p16_p2) target bundleno = 5 (0x5), region = 77 }
 0x348   :  { %486 = vsyncpa [#allocation3], 1 }
 0x349   :  { %488 = vsyncpa [#allocation3 + $0x1], 1 }
 0x34a   :  { %489 = vsyncpa [#allocation4], 1 }
 0x34b   :  { %491 = vsyncpa [#allocation4 + $0x1], 1 }

</bundles_post_ra>
